<compile_context>
chip_gen: v6e
topology: v6e:2x2x1
jax: 0.10.0
libtpu: 0.0.40
codegen_flags: <defaults>
</compile_context>

<pallas_src>
import math

import jax
import jax.numpy as jnp
from jax import lax
from jax.experimental import pallas as pl
from jax.experimental.pallas import tpu as pltpu


def _dual_tensorcore():
    """True on chips with 2 TensorCores sharing one JAX device (v4/v5p/v7x)."""
    try:
        kind = jax.devices()[0].device_kind.lower().replace(" ", "")
    except Exception:  # pragma: no cover - defensive
        return False
    return any(tag in kind for tag in ("v4", "v5p", "v7", "tpu7"))


def _gc4d_kernel(T, V, Cin, Cout, B):
    TV = T * V
    VC = V * Cout
    inv = 1.0 / math.sqrt(Cout)

    def kernel(x_ref, comb_ref, p_ref, wall_ref, cmask_ref, esel_ref, b_ref,
               o_ref, u_ref, z_ref):
        comb = comb_ref[...]          # (TV, TV) merged softsign mask (adj + same-node)
        p = p_ref[...]                # (TV, TV) s*adj (spatial) + t (temporal), pre-placed

        # --- per-element dynamic operator + aggregation: u_e = m_op_e @ x_e ---
        def mop_body(e, carry):
            row = pl.multiple_of(e * TV, TV)
            xs = x_ref[pl.ds(row, TV), :]                        # (TV, Cin)
            xm = jnp.mean(xs, axis=-1, keepdims=True)            # (TV, 1)
            diff = xm - jnp.transpose(xm, (1, 0))                # (TV, TV)
            dc = diff * comb                                     # merged spatial+temporal arg
            den = 1.0 + jnp.abs(dc)
            r = pl.reciprocal(den, approx=True)                  # EUP slot
            r = r * (2.0 - den * r)                              # one Newton step -> f32-exact
            m_op = p + (dc * inv) * r                            # fused spatio-temporal operator
            u_ref[pl.ds(row, TV), :] = jnp.dot(
                m_op, xs, preferred_element_type=jnp.float32)    # (TV, Cin)
            return carry

        lax.fori_loop(0, B, mop_body, 0, unroll=True)

        # --- one batched weight contraction for the whole block ---
        # Z[(e,t,vr), v*Cout+c] = sum_j U[(e,t,vr), j] * weight[v, j, c]
        z_ref[...] = jnp.dot(u_ref[...], wall_ref[...],
                             preferred_element_type=jnp.float32)  # (B*TV, VC)

        cmask = cmask_ref[...]        # (TV, VC) keeps rows whose node matches the column block
        esel = esel_ref[...]          # (T, TV) collapses (t, vr) rows to frame rows
        bias = b_ref[...]             # (1, VC)

        # --- per-element node-diagonal selection + lane-dense store ---
        def sel_body(e, carry):
            zrow = pl.multiple_of(e * TV, TV)
            orow = pl.multiple_of(e * T, T)
            z_e = z_ref[pl.ds(zrow, TV), :]                      # (TV, VC)
            o_ref[pl.ds(orow, T), :] = jnp.dot(
                esel, z_e * cmask,
                preferred_element_type=jnp.float32) + bias       # (T, VC) unmasked store
            return carry

        lax.fori_loop(0, B, sel_body, 0, unroll=True)

    return kernel


def gc4d_precompute(adj_mask, weight, s, t, bias):
    """Parameter-only preprocessing. Compute once and reuse across forward calls."""
    T, V, _ = s.shape
    Cin, Cout = weight.shape[1], weight.shape[2]
    TV, VC = T * V, V * Cout
    dt = jnp.float32

    eye_t = jnp.eye(T, dtype=dt)
    eye_v = jnp.eye(V, dtype=dt)

    # spatial operator (block-diagonal over frames): (s*adj)[t,v,v'] at ((t,v),(t,v'))
    s_m = (s * adj_mask).astype(dt)
    s_big = (eye_t[:, None, :, None] * s_m[:, :, None, :]).reshape(TV, TV)
    # temporal operator (block-diagonal over nodes): t[v,t,t'] at ((t,v),(t',v))
    t_big = (jnp.transpose(t, (1, 0, 2)).astype(dt)[:, :, :, None]
             * eye_v[None, :, None, :]).reshape(TV, TV)
    p_big = s_big + t_big

    # merged softsign mask: adjacency (within-frame) + same-node (across frames).
    # Their off-diagonal supports are disjoint; on the shared ((t,v),(t,v))
    # diagonal diff == 0, so softsign(diff*combined) == ss + tt exactly.
    adj_big = (eye_t[:, None, :, None]
               * adj_mask.astype(dt)[:, :, None, :]).reshape(TV, TV)
    mask_v = jnp.tile(eye_v, (T, T))
    combined = adj_big + mask_v

    # weights of all nodes concatenated along the lane axis: W_all[j, v*Cout+c] = w[v,j,c]
    w_all = jnp.transpose(weight, (1, 0, 2)).reshape(Cin, VC).astype(dt)
    # column mask selecting, for output column v*Cout+c, the rows with node index v
    cmask = jnp.tile(jnp.repeat(eye_v, Cout, axis=1), (T, 1))               # (TV, VC)
    # frame selector collapsing (t, vr) rows to t rows
    e_sel = jnp.repeat(eye_t, V, axis=1)                                    # (T, TV)
    bias_big = jnp.tile(bias.astype(dt), V).reshape(1, VC)                  # (1, VC)

    return dict(T=T, V=V, Cin=Cin, Cout=Cout,
                combined=combined, p_big=p_big, w_all=w_all,
                cmask=cmask, e_sel=e_sel, bias_big=bias_big)


def gc4d_apply(x, ops):
    T, V, Cin, Cout = ops["T"], ops["V"], ops["Cin"], ops["Cout"]
    N = x.shape[0]
    TV, VC = T * V, V * Cout
    dt = jnp.float32

    # Batch-block sizing: amortize per-grid-step overhead, but keep >= 2 grid
    # steps on dual-TensorCore chips so both cores get work.
    n_steps = 2 if (_dual_tensorcore() and N >= 2) else 1
    B = -(-N // n_steps)          # ceil
    B = min(B, 8)                 # bound scratch VMEM (Z scratch = B * 64 KB here)
    n_steps = -(-N // B)
    N_pad = n_steps * B

    x_flat = x.reshape(N * TV, Cin).astype(dt)
    if N_pad != N:
        x_flat = jnp.concatenate(
            [x_flat, jnp.zeros(((N_pad - N) * TV, Cin), dt)], axis=0)

    kernel = _gc4d_kernel(T, V, Cin, Cout, B)

    out2d = pl.pallas_call(
        kernel,
        out_shape=jax.ShapeDtypeStruct((N_pad * T, VC), dt),
        grid_spec=pltpu.PrefetchScalarGridSpec(
            num_scalar_prefetch=0,
            grid=(n_steps,),
            in_specs=[
                pl.BlockSpec((B * TV, Cin), lambda n: (n, 0)),   # x block
                pl.BlockSpec((TV, TV), lambda n: (0, 0)),        # combined (grid-invariant)
                pl.BlockSpec((TV, TV), lambda n: (0, 0)),        # p_big    (grid-invariant)
                pl.BlockSpec((Cin, VC), lambda n: (0, 0)),       # w_all    (grid-invariant)
                pl.BlockSpec((TV, VC), lambda n: (0, 0)),        # cmask    (grid-invariant)
                pl.BlockSpec((T, TV), lambda n: (0, 0)),         # e_sel    (grid-invariant)
                pl.BlockSpec((1, VC), lambda n: (0, 0)),         # bias     (grid-invariant)
            ],
            out_specs=pl.BlockSpec((B * T, VC), lambda n: (n, 0)),
            scratch_shapes=[
                pltpu.VMEM((B * TV, Cin), dt),                   # U  (per-block aggregations)
                pltpu.VMEM((B * TV, VC), dt),                    # Z  (batched weight contraction)
            ],
        ),
        compiler_params=pltpu.CompilerParams(
            dimension_semantics=("parallel",)),
    )(x_flat, ops["combined"], ops["p_big"], ops["w_all"],
      ops["cmask"], ops["e_sel"], ops["bias_big"])

    return out2d[:N * T].reshape(N, T, V, Cout)


def gc4d_forward(x, adj_mask, weight, s, t, bias):
    """Convenience wrapper; for repeated calls cache gc4d_precompute(...)."""
    return gc4d_apply(x, gc4d_precompute(adj_mask, weight, s, t, bias))


def _softsign(x):
    return x / (1.0 + jnp.abs(x))


def gc4d_reference(x, adj_mask, weight, s, t, bias):
    """Pure-JAX transcription of the PyTorch forward (dynamic, no neigh_norm)."""
    Cout = weight.shape[-1]
    inv = 1.0 / math.sqrt(Cout)
    s_m = s * adj_mask                                               # (T,V,V)
    xm = jnp.mean(x, axis=-1)                                        # (N,T,V)
    x1 = _softsign(xm[:, :, None, :] - xm[:, None, :, :]) * inv      # (N,T,T,V)
    tt = jnp.transpose(x1, (0, 3, 1, 2))                             # (N,V,T,T)
    x2 = _softsign((xm[..., :, None] - xm[..., None, :]) * adj_mask[None]) * inv  # (N,T,V,V)
    aggreg_s = jnp.einsum('ntvi,ntic->ntvc', s_m[None] + x2, x)
    aggreg_t = jnp.einsum('nvtj,njvc->ntvc', t[None] + tt, x)
    support = aggreg_s + aggreg_t
    out = jnp.einsum('ntvj,vjc->ntvc', support, weight)
    return out + bias


if __name__ == "__main__":
    # Small shapes consistent with the module: batch=2, frame_n=8, node_n=8,
    # in_features=16, out_features=32.
    N, T, V, Cin, Cout = 2, 8, 8, 16, 32

    key = jax.random.PRNGKey(0)
    k_x, k_adj, k_w, k_s, k_t, k_b = jax.random.split(key, 6)

    # Deterministic parameter init mirroring reset_parameters (uniform(-stdv, stdv)).
    stdv = 1.0 / math.sqrt(Cout)
    weight = jax.random.uniform(k_w, (V, Cin, Cout), jnp.float32, -stdv, stdv)
    s = jax.random.uniform(k_s, (T, V, V), jnp.float32, -stdv, stdv)
    t = jax.random.uniform(k_t, (V, T, T), jnp.float32, -stdv, stdv)
    bias = jax.random.uniform(k_b, (Cout,), jnp.float32, -stdv, stdv)

    x = jax.random.normal(k_x, (N, T, V, Cin), jnp.float32)
    adj_spatial = (jax.random.uniform(k_adj, (V, V)) > 0.3).astype(jnp.float32)
    adj_mask = jnp.broadcast_to(adj_spatial, (T, V, V))   # same spatial mask per frame

    # Parameter-only preprocessing done once (cacheable across forward calls).
    ops = gc4d_precompute(adj_mask, weight, s, t, bias)
    ops = jax.tree_util.tree_map(
        lambda a: jax.block_until_ready(a) if isinstance(a, jax.Array) else a, ops)

    out = gc4d_apply(x, ops)
    out = jax.block_until_ready(out)

    ref = gc4d_reference(x, adj_mask, weight, s, t, bias)
    assert out.shape == (N, T, V, Cout)
    max_err = float(jnp.max(jnp.abs(out - ref)))
    assert jnp.allclose(out, ref, atol=1e-4, rtol=1e-4), max_err

    print("KERNEL_OK")
</pallas_src>

<mosaic_0001>
module attributes {stable_mosaic.version = 11 : i64} {
  func.func @kernel(%arg0: i32, %arg1: memref<128x16xf32, #tpu.memory_space<vmem>>, %arg2: memref<64x64xf32, #tpu.memory_space<vmem>>, %arg3: memref<64x64xf32, #tpu.memory_space<vmem>>, %arg4: memref<16x256xf32, #tpu.memory_space<vmem>>, %arg5: memref<64x256xf32, #tpu.memory_space<vmem>>, %arg6: memref<8x64xf32, #tpu.memory_space<vmem>>, %arg7: memref<1x256xf32, #tpu.memory_space<vmem>>, %arg8: memref<16x256xf32, #tpu.memory_space<vmem>>, %arg9: memref<128x16xf32, #tpu.memory_space<vmem>>, %arg10: memref<128x256xf32, #tpu.memory_space<vmem>>) attributes {dimension_semantics = [#tpu.dimension_semantics<parallel>], iteration_bounds = array<i64: 1>, scalar_prefetch = 0 : i64, scratch_operands = 2 : i64, tpu.core_type = #tpu.core_type<tc>, window_params = [{transform_indices = @transform_0, window_bounds = array<i64: 128, 16>}, {pipeline_mode = #tpu.pipeline_mode<synchronous>, transform_indices = @transform_1, window_bounds = array<i64: 64, 64>}, {pipeline_mode = #tpu.pipeline_mode<synchronous>, transform_indices = @transform_2, window_bounds = array<i64: 64, 64>}, {pipeline_mode = #tpu.pipeline_mode<synchronous>, transform_indices = @transform_3, window_bounds = array<i64: 16, 256>}, {pipeline_mode = #tpu.pipeline_mode<synchronous>, transform_indices = @transform_4, window_bounds = array<i64: 64, 256>}, {pipeline_mode = #tpu.pipeline_mode<synchronous>, transform_indices = @transform_5, window_bounds = array<i64: 8, 64>}, {pipeline_mode = #tpu.pipeline_mode<synchronous>, transform_indices = @transform_6, window_bounds = array<i64: 1, 256>}, {transform_indices = @transform_7, window_bounds = array<i64: 16, 256>}]} {
    %c0 = arith.constant 0 : index
    %c0_0 = arith.constant 0 : index
    %0 = vector.load %arg2[%c0, %c0_0] : memref<64x64xf32, #tpu.memory_space<vmem>>, vector<64x64xf32>
    %c0_1 = arith.constant 0 : index
    %c0_2 = arith.constant 0 : index
    %1 = vector.load %arg3[%c0_1, %c0_2] : memref<64x64xf32, #tpu.memory_space<vmem>>, vector<64x64xf32>
    %c0_i32 = arith.constant 0 : i32
    %c64_i32 = arith.constant 64 : i32
    %2 = arith.muli %c0_i32, %c64_i32 : i32
    %3 = tpu.assume_multiple %2, 64 : i32
    %4 = arith.index_cast %3 : i32 to index
    %c0_3 = arith.constant 0 : index
    %5 = vector.load %arg1[%4, %c0_3] : memref<128x16xf32, #tpu.memory_space<vmem>>, vector<64x16xf32>
    %cst = arith.constant dense<0.000000e+00> : vector<64xf32>
    %6 = vector.multi_reduction <add>, %5, %cst [1] : vector<64x16xf32> to vector<64xf32>
    %7 = vector.shape_cast %6 : vector<64xf32> to vector<64x1xf32>
    %cst_4 = arith.constant 1.600000e+01 : f32
    %8 = vector.broadcast %cst_4 : f32 to vector<64x1xf32>
    %9 = arith.divf %7, %8 : vector<64x1xf32>
    %10 = tpu.transpose %9, [1, 0] : vector<64x1xf32> -> vector<1x64xf32>
    %11 = vector.broadcast %9 : vector<64x1xf32> to vector<64x64xf32>
    %12 = vector.broadcast %10 : vector<1x64xf32> to vector<64x64xf32>
    %13 = arith.subf %11, %12 : vector<64x64xf32>
    %14 = arith.mulf %13, %0 : vector<64x64xf32>
    %15 = math.absf %14 : vector<64x64xf32>
    %cst_5 = arith.constant 1.000000e+00 : f32
    %16 = vector.broadcast %cst_5 : f32 to vector<64x64xf32>
    %17 = arith.addf %16, %15 : vector<64x64xf32>
    %18 = tpu.reciprocal %17 {approx = true} : vector<64x64xf32> -> vector<64x64xf32>
    %19 = arith.mulf %17, %18 : vector<64x64xf32>
    %cst_6 = arith.constant 2.000000e+00 : f32
    %20 = vector.broadcast %cst_6 : f32 to vector<64x64xf32>
    %21 = arith.subf %20, %19 : vector<64x64xf32>
    %22 = arith.mulf %18, %21 : vector<64x64xf32>
    %cst_7 = arith.constant 0.176776692 : f32
    %23 = vector.broadcast %cst_7 : f32 to vector<64x64xf32>
    %24 = arith.mulf %14, %23 : vector<64x64xf32>
    %25 = arith.mulf %24, %22 : vector<64x64xf32>
    %26 = arith.addf %1, %25 : vector<64x64xf32>
    %cst_8 = arith.constant dense<0.000000e+00> : vector<64x16xf32>
    %27 = tpu.matmul %26, %5, %cst_8 {dimension_numbers = #tpu.dot_dimension_numbers<[1], [0], [0], [1], [0, 0, 1, 1], [], []>} : vector<64x64xf32>, vector<64x16xf32>, vector<64x16xf32> -> vector<64x16xf32>
    %28 = arith.index_cast %3 : i32 to index
    %c0_9 = arith.constant 0 : index
    %29 = vector.load %arg9[%28, %c0_9] : memref<128x16xf32, #tpu.memory_space<vmem>>, vector<64x16xf32>
    tpu.vector_store %arg9[%28, %c0_9], %27 {strides = array<i32>} : memref<128x16xf32, #tpu.memory_space<vmem>>, vector<64x16xf32>,
    %c1_i32 = arith.constant 1 : i32
    %c64_i32_10 = arith.constant 64 : i32
    %30 = arith.muli %c1_i32, %c64_i32_10 : i32
    %31 = tpu.assume_multiple %30, 64 : i32
    %32 = arith.index_cast %31 : i32 to index
    %c0_11 = arith.constant 0 : index
    %33 = vector.load %arg1[%32, %c0_11] : memref<128x16xf32, #tpu.memory_space<vmem>>, vector<64x16xf32>
    %cst_12 = arith.constant dense<0.000000e+00> : vector<64xf32>
    %34 = vector.multi_reduction <add>, %33, %cst_12 [1] : vector<64x16xf32> to vector<64xf32>
    %35 = vector.shape_cast %34 : vector<64xf32> to vector<64x1xf32>
    %cst_13 = arith.constant 1.600000e+01 : f32
    %36 = vector.broadcast %cst_13 : f32 to vector<64x1xf32>
    %37 = arith.divf %35, %36 : vector<64x1xf32>
    %38 = tpu.transpose %37, [1, 0] : vector<64x1xf32> -> vector<1x64xf32>
    %39 = vector.broadcast %37 : vector<64x1xf32> to vector<64x64xf32>
    %40 = vector.broadcast %38 : vector<1x64xf32> to vector<64x64xf32>
    %41 = arith.subf %39, %40 : vector<64x64xf32>
    %42 = arith.mulf %41, %0 : vector<64x64xf32>
    %43 = math.absf %42 : vector<64x64xf32>
    %cst_14 = arith.constant 1.000000e+00 : f32
    %44 = vector.broadcast %cst_14 : f32 to vector<64x64xf32>
    %45 = arith.addf %44, %43 : vector<64x64xf32>
    %46 = tpu.reciprocal %45 {approx = true} : vector<64x64xf32> -> vector<64x64xf32>
    %47 = arith.mulf %45, %46 : vector<64x64xf32>
    %cst_15 = arith.constant 2.000000e+00 : f32
    %48 = vector.broadcast %cst_15 : f32 to vector<64x64xf32>
    %49 = arith.subf %48, %47 : vector<64x64xf32>
    %50 = arith.mulf %46, %49 : vector<64x64xf32>
    %cst_16 = arith.constant 0.176776692 : f32
    %51 = vector.broadcast %cst_16 : f32 to vector<64x64xf32>
    %52 = arith.mulf %42, %51 : vector<64x64xf32>
    %53 = arith.mulf %52, %50 : vector<64x64xf32>
    %54 = arith.addf %1, %53 : vector<64x64xf32>
    %cst_17 = arith.constant dense<0.000000e+00> : vector<64x16xf32>
    %55 = tpu.matmul %54, %33, %cst_17 {dimension_numbers = #tpu.dot_dimension_numbers<[1], [0], [0], [1], [0, 0, 1, 1], [], []>} : vector<64x64xf32>, vector<64x16xf32>, vector<64x16xf32> -> vector<64x16xf32>
    %56 = arith.index_cast %31 : i32 to index
    %c0_18 = arith.constant 0 : index
    %57 = vector.load %arg9[%56, %c0_18] : memref<128x16xf32, #tpu.memory_space<vmem>>, vector<64x16xf32>
    tpu.vector_store %arg9[%56, %c0_18], %55 {strides = array<i32>} : memref<128x16xf32, #tpu.memory_space<vmem>>, vector<64x16xf32>,
    %c2_i32 = arith.constant 2 : i32
    %c0_19 = arith.constant 0 : index
    %c0_20 = arith.constant 0 : index
    %58 = vector.load %arg9[%c0_19, %c0_20] : memref<128x16xf32, #tpu.memory_space<vmem>>, vector<128x16xf32>
    %c0_21 = arith.constant 0 : index
    %c0_22 = arith.constant 0 : index
    %59 = vector.load %arg4[%c0_21, %c0_22] : memref<16x256xf32, #tpu.memory_space<vmem>>, vector<16x256xf32>
    %cst_23 = arith.constant dense<0.000000e+00> : vector<128x256xf32>
    %60 = tpu.matmul %58, %59, %cst_23 {dimension_numbers = #tpu.dot_dimension_numbers<[1], [0], [0], [1], [0, 0, 1, 1], [], []>} : vector<128x16xf32>, vector<16x256xf32>, vector<128x256xf32> -> vector<128x256xf32>
    %c0_24 = arith.constant 0 : index
    %c0_25 = arith.constant 0 : index
    %61 = vector.load %arg10[%c0_24, %c0_25] : memref<128x256xf32, #tpu.memory_space<vmem>>, vector<128x256xf32>
    tpu.vector_store %arg10[%c0_24, %c0_25], %60 {strides = array<i32>} : memref<128x256xf32, #tpu.memory_space<vmem>>, vector<128x256xf32>,
    %c0_26 = arith.constant 0 : index
    %c0_27 = arith.constant 0 : index
    %62 = vector.load %arg5[%c0_26, %c0_27] : memref<64x256xf32, #tpu.memory_space<vmem>>, vector<64x256xf32>
    %c0_28 = arith.constant 0 : index
    %c0_29 = arith.constant 0 : index
    %63 = vector.load %arg6[%c0_28, %c0_29] : memref<8x64xf32, #tpu.memory_space<vmem>>, vector<8x64xf32>
    %c0_30 = arith.constant 0 : index
    %c0_31 = arith.constant 0 : index
    %64 = vector.load %arg7[%c0_30, %c0_31] : memref<1x256xf32, #tpu.memory_space<vmem>>, vector<1x256xf32>
    %c0_i32_32 = arith.constant 0 : i32
    %c64_i32_33 = arith.constant 64 : i32
    %65 = arith.muli %c0_i32_32, %c64_i32_33 : i32
    %66 = tpu.assume_multiple %65, 64 : i32
    %c8_i32 = arith.constant 8 : i32
    %67 = arith.muli %c0_i32_32, %c8_i32 : i32
    %68 = tpu.assume_multiple %67, 8 : i32
    %69 = arith.index_cast %66 : i32 to index
    %c0_34 = arith.constant 0 : index
    %70 = vector.load %arg10[%69, %c0_34] : memref<128x256xf32, #tpu.memory_space<vmem>>, vector<64x256xf32>
    %71 = arith.mulf %70, %62 : vector<64x256xf32>
    %cst_35 = arith.constant dense<0.000000e+00> : vector<8x256xf32>
    %72 = tpu.matmul %63, %71, %cst_35 {dimension_numbers = #tpu.dot_dimension_numbers<[1], [0], [0], [1], [0, 0, 1, 1], [], []>} : vector<8x64xf32>, vector<64x256xf32>, vector<8x256xf32> -> vector<8x256xf32>
    %73 = vector.broadcast %64 : vector<1x256xf32> to vector<8x256xf32>
    %74 = arith.addf %72, %73 : vector<8x256xf32>
    %75 = arith.index_cast %68 : i32 to index
    %c0_36 = arith.constant 0 : index
    %76 = vector.load %arg8[%75, %c0_36] : memref<16x256xf32, #tpu.memory_space<vmem>>, vector<8x256xf32>
    tpu.vector_store %arg8[%75, %c0_36], %74 {strides = array<i32>} : memref<16x256xf32, #tpu.memory_space<vmem>>, vector<8x256xf32>,
    %c1_i32_37 = arith.constant 1 : i32
    %c64_i32_38 = arith.constant 64 : i32
    %77 = arith.muli %c1_i32_37, %c64_i32_38 : i32
    %78 = tpu.assume_multiple %77, 64 : i32
    %c8_i32_39 = arith.constant 8 : i32
    %79 = arith.muli %c1_i32_37, %c8_i32_39 : i32
    %80 = tpu.assume_multiple %79, 8 : i32
    %81 = arith.index_cast %78 : i32 to index
    %c0_40 = arith.constant 0 : index
    %82 = vector.load %arg10[%81, %c0_40] : memref<128x256xf32, #tpu.memory_space<vmem>>, vector<64x256xf32>
    %83 = arith.mulf %82, %62 : vector<64x256xf32>
    %cst_41 = arith.constant dense<0.000000e+00> : vector<8x256xf32>
    %84 = tpu.matmul %63, %83, %cst_41 {dimension_numbers = #tpu.dot_dimension_numbers<[1], [0], [0], [1], [0, 0, 1, 1], [], []>} : vector<8x64xf32>, vector<64x256xf32>, vector<8x256xf32> -> vector<8x256xf32>
    %85 = vector.broadcast %64 : vector<1x256xf32> to vector<8x256xf32>
    %86 = arith.addf %84, %85 : vector<8x256xf32>
    %87 = arith.index_cast %80 : i32 to index
    %c0_42 = arith.constant 0 : index
    %88 = vector.load %arg8[%87, %c0_42] : memref<16x256xf32, #tpu.memory_space<vmem>>, vector<8x256xf32>
    tpu.vector_store %arg8[%87, %c0_42], %86 {strides = array<i32>} : memref<16x256xf32, #tpu.memory_space<vmem>>, vector<8x256xf32>,
    %c2_i32_43 = arith.constant 2 : i32
    return
  }
  func.func @transform_0(%arg0: i32) -> (i32, i32) {
    %c0_i32 = arith.constant 0 : i32
    %c0_i32_0 = arith.constant 0 : i32
    return %arg0, %c0_i32 : i32, i32
  }
  func.func @transform_1(%arg0: i32) -> (i32, i32) {
    %c0_i32 = arith.constant 0 : i32
    %c0_i32_0 = arith.constant 0 : i32
    %c0_i32_1 = arith.constant 0 : i32
    return %c0_i32, %c0_i32_0 : i32, i32
  }
  func.func @transform_2(%arg0: i32) -> (i32, i32) {
    %c0_i32 = arith.constant 0 : i32
    %c0_i32_0 = arith.constant 0 : i32
    %c0_i32_1 = arith.constant 0 : i32
    return %c0_i32, %c0_i32_0 : i32, i32
  }
  func.func @transform_3(%arg0: i32) -> (i32, i32) {
    %c0_i32 = arith.constant 0 : i32
    %c0_i32_0 = arith.constant 0 : i32
    %c0_i32_1 = arith.constant 0 : i32
    return %c0_i32, %c0_i32_0 : i32, i32
  }
  func.func @transform_4(%arg0: i32) -> (i32, i32) {
    %c0_i32 = arith.constant 0 : i32
    %c0_i32_0 = arith.constant 0 : i32
    %c0_i32_1 = arith.constant 0 : i32
    return %c0_i32, %c0_i32_0 : i32, i32
  }
  func.func @transform_5(%arg0: i32) -> (i32, i32) {
    %c0_i32 = arith.constant 0 : i32
    %c0_i32_0 = arith.constant 0 : i32
    %c0_i32_1 = arith.constant 0 : i32
    return %c0_i32, %c0_i32_0 : i32, i32
  }
  func.func @transform_6(%arg0: i32) -> (i32, i32) {
    %c0_i32 = arith.constant 0 : i32
    %c0_i32_0 = arith.constant 0 : i32
    %c0_i32_1 = arith.constant 0 : i32
    return %c0_i32, %c0_i32_0 : i32, i32
  }
  func.func @transform_7(%arg0: i32) -> (i32, i32) {
    %c0_i32 = arith.constant 0 : i32
    %c0_i32_0 = arith.constant 0 : i32
    return %arg0, %c0_i32 : i32, i32
  }
}

</mosaic_0001>

<bundles_post_ra>
// kernel: tpu_custom_call.1
= control target key start
LH: loop header
LB: loop body
LE: loop exit
PB: predicated region body
PF: predicated region fallthrough
CT: control target
= control target key end

     0   :  { %12 = vsyncpa [#allocation5], 0  ;;  %s2008_s0 = inlined_call_operand.vmem [shape: f32[128,16], index: 0, kind: input, shape index: {}]   ;;  %s2009_s1 = inlined_call_operand.hbm [shape: f32[64,64], index: 1, kind: input, shape index: {}]   ;;  %s2010_s2 = inlined_call_operand.hbm [shape: f32[64,64], index: 2, kind: input, shape index: {}]   ;;  %s2011_s3 = inlined_call_operand.hbm [shape: f32[16,256], index: 3, kind: input, shape index: {}]   ;;  %s2012_s4 = inlined_call_operand.vmem [shape: f32[64,256], index: 4, kind: input, shape index: {}]   ;;  %s2013_s5 = inlined_call_operand.vmem [shape: f32[8,64], index: 5, kind: input, shape index: {}]   ;;  %s2014_s6 = inlined_call_operand.vmem [shape: f32[1,256], index: 6, kind: input, shape index: {}]   ;;  %s2015_s7 = inlined_call_operand.hbm [shape: f32[16,256], index: 7, kind: output, shape index: {}]  }
   0x1   :  { %13 = vsyncpa [#allocation8], 0 }
   0x2   :  { %14 = vsyncpa [#allocation6], 0  ;;  %s1483_s24 = smov [#allocation7]   ;;  %s1484_s26 = smov [#allocation4]  }
   0x3   :  { %s34_s25 = sshll.u32 %s1483_s24, 4  ;;  %s22_s27 = sshll.u32 %s1484_s26, 4  ;;  %s35_s25 = int_to_ptr.vmem [resolvable:$true] %s34_s25  ;;  %s23_s27 = int_to_ptr.vmem [resolvable:$true] %s22_s27 }
   0x4   :  { %s1405_s28 = scalar_lea.vmem %s35_s25, 1024  ;;  %p1410_p1 = scmp.lt.s32.totalorder %s35_s25, %s35_s25 }
   0x5   :  { %p1406_p0 = scmp.ne.s32.totalorder %s35_s25, %s1405_s28  ;;  %p1411_p2 = scmp.lt.s32.totalorder %s1405_s28, %s1405_s28 }
   0x7   :  { %p1412_p3 = por %p1411_p2, %p1410_p1 }
   0x9   :  { %p1413_p4 = pnand %p1412_p3, %p1406_p0 }
   0xb   :  { %1416 = shalt.err (!%p1413_p4)
}
   0xc   :  { %s1485_s29 = smov 128   ;;  %s1486_s30 = smov 8  }
   0xd   :  { %40 = dma.hbm_to_vmem [thread:$0]  %s2010_s2, 1024, %s35_s25, [#allocation8], %s1485_s29, %s1485_s29, %s1486_s30  }
   0xe   :  { %s1425_s10 = scalar_lea.vmem %s23_s27, 1024  ;;  %p1430_p6 = scmp.lt.s32.totalorder %s23_s27, %s23_s27 }
   0xf   :  { %p1426_p5 = scmp.ne.s32.totalorder %s23_s27, %s1425_s10  ;;  %p1431_p7 = scmp.lt.s32.totalorder %s1425_s10, %s1425_s10 }
  0x11   :  { %p1432_p8 = por %p1431_p7, %p1430_p6 }
  0x13   :  { %p1433_p9 = pnand %p1432_p8, %p1426_p5 }
  0x15   :  { %1436 = shalt.err (!%p1433_p9)
}
  0x16   :  { %28 = dma.hbm_to_vmem [thread:$0]  %s2009_s1, 1024, %s23_s27, [#allocation5], %s1485_s29, %s1485_s29, %s1486_s30  }
  0x17   :  { %s1487_s13 = smov [#allocation9]  }
  0x18   :  { %s46_s14 = sshll.u32 %s1487_s13, 4  ;;  %s47_s14 = int_to_ptr.vmem [resolvable:$true] %s46_s14 }
  0x19   :  { %s1445_s15 = scalar_lea.vmem %s47_s14, 512  ;;  %p1450_p11 = scmp.lt.s32.totalorder %s47_s14, %s47_s14 }
  0x1a   :  { %p1446_p10 = scmp.ne.s32.totalorder %s47_s14, %s1445_s15  ;;  %p1451_p12 = scmp.lt.s32.totalorder %s1445_s15, %s1445_s15 }
  0x1c   :  { %p1452_p13 = por %p1451_p12, %p1450_p11 }
  0x1e   :  { %p1453_p0 = pnand %p1452_p13, %p1446_p10 }
  0x20   :  { %1456 = shalt.err (!%p1453_p0)
}
  0x21   :  { %s1488_s2 = smov 256   ;;  %s1489_s16 = smov 16  }
  0x22   :  { %52 = dma.hbm_to_vmem [thread:$0]  %s2011_s3, 512, %s47_s14, [#allocation8], %s1488_s2, %s1488_s2, %s1489_s16  }
  0x23   :  { %1477 = dma.done.wait [#allocation5], 1024  }
  0x24   :  { %1478 = vsyncadd [#allocation5], 4294966272 }
  0x25   :  { %1479 = dma.done.wait [#allocation8], 1536  }
  0x26   :  { %1480 = vsyncadd [#allocation8], 4294965760  ;;  %vm92_vm0 = vcmask 130048   ;;  %v84_v0 = vld [vmem:[%s2008_s0] sm:$0xff]  ;;  %v86_v1 = vld [vmem:[%s2008_s0 + $0x10] sm:$0xff]  ;;  %vm250_vm1 = vcmask 523264  }
  0x27   :  { %v85_v2 = vld [vmem:[%s2008_s0 + $0x8] sm:$0xff]  ;;  %v93_v3 = vsel %vm92_vm0, %v84_v0, 0.0  ;;  %v99_v4 = vsel %vm92_vm0, %v86_v1, 0.0  ;;  %v87_v5 = vld [vmem:[%s2008_s0 + $0x18] sm:$0xff]  ;;  %v88_v9 = vld [vmem:[%s2008_s0 + $0x20] sm:$0xff]  ;;  %s1491_s10 = smov [#allocation10]  }
  0x28   :  { %94 = vadd.xlane.f32.xlu0 %v93_v3  ;;  %100 = vadd.xlane.f32.xlu1 %v99_v4  ;;  %v91_v6 = vld [vmem:[%s2008_s0 + $0x38] sm:$0xff]  ;;  %v96_v7 = vsel %vm92_vm0, %v85_v2, 0.0  ;;  %v102_v8 = vsel %vm92_vm0, %v87_v5, 0.0  ;;  %v89_v10 = vld [vmem:[%s2008_s0 + $0x28] sm:$0xff]  ;;  %v90_v11 = vld [vmem:[%s2008_s0 + $0x30] sm:$0xff]  ;;  %v105_v12 = vsel %vm92_vm0, %v88_v9, 0.0 }
  0x29   :  { %1300 = vmatprep.subr.mxu1 %v91_v6  ;;  %v108_v13 = vsel %vm92_vm0, %v89_v10, 0.0  ;;  %v111_v14 = vsel %vm92_vm0, %v90_v11, 0.0  ;;  %v114_v15 = vsel %vm92_vm0, %v91_v6, 0.0  ;;  %v1579_v16 = vld [vmem:[%s2008_s0 + $0x40] sm:$0xff]  ;;  %v1584_v17 = vld [vmem:[%s2008_s0 + $0x48] sm:$0xff]  ;;  %v1593_v20 = vld [vmem:[%s2008_s0 + $0x50] sm:$0xff] }
  0x2a   :  { %1301 = vmatpush3.msra.mxu1 %v91_v6  ;;  %v397_v18 = vsel %vm92_vm0, %v1579_v16, 0.0  ;;  %v400_v19 = vsel %vm92_vm0, %v1584_v17, 0.0  ;;  %v1598_v21 = vld [vmem:[%s2008_s0 + $0x58] sm:$0xff]  ;;  %v403_v22 = vsel %vm92_vm0, %v1593_v20, 0.0  ;;  %v1607_v24 = vld [vmem:[%s2008_s0 + $0x60] sm:$0xff]  ;;  %v1612_v25 = vld [vmem:[%s2008_s0 + $0x68] sm:$0xff] }
  0x2b   :  { %1302 = vmatprep.subr.mxu1 %v90_v11  ;;  %v406_v23 = vsel %vm92_vm0, %v1598_v21, 0.0  ;;  %v409_v26 = vsel %vm92_vm0, %v1607_v24, 0.0  ;;  %v412_v27 = vsel %vm92_vm0, %v1612_v25, 0.0  ;;  %v1621_v28 = vld [vmem:[%s2008_s0 + $0x78] sm:$0xff]  ;;  %v1626_v29 = vld [vmem:[%s2008_s0 + $0x70] sm:$0xff]  ;;  %v69_v6 = vld [vmem:[#allocation4 + $0x8] sm:$0xff] }
  0x2c   :  { %97 = vadd.xlane.f32.xlu0 %v96_v7  ;;  %103 = vadd.xlane.f32.xlu1 %v102_v8  ;;  %v415_v30 = vsel %vm92_vm0, %v1626_v29, 0.0  ;;  %v418_v31 = vsel %vm92_vm0, %v1621_v28, 0.0  ;;  %v70_v7 = vld [vmem:[#allocation4 + $0x10] sm:$0xff]  ;;  %v71_v8 = vld [vmem:[#allocation4 + $0x18] sm:$0xff]  ;;  %s1211_s11 = sshll.u32 %s1491_s10, 4  ;;  %s1212_s11 = int_to_ptr.vmem [resolvable:$true] %s1211_s11 }
  0x2d   :  { %1303 = vmatpush3.msra.mxu1 %v90_v11  ;;  %p1462_p2 = scmp.lt.s32.totalorder %s1212_s11, %s1212_s11 }
  0x2e   :  { %1304 = vmatprep.subr.mxu1 %v89_v10 }
  0x2f   :  { %1305 = vmatpush3.msra.mxu1 %v89_v10 }
  0x30   :  { %106 = vadd.xlane.f32.xlu0 %v105_v12  ;;  %109 = vadd.xlane.f32.xlu1 %v108_v13  ;;  %v72_v13 = vld [vmem:[#allocation4 + $0x20] sm:$0xff] }
  0x31   :  { %1306 = vmatprep.subr.mxu1 %v88_v9 }
  0x32   :  { %1307 = vmatpush3.msra.mxu1 %v88_v9 }
  0x33   :  { %1308 = vmatprep.subr.mxu1 %v87_v5 }
  0x34   :  { %112 = vadd.xlane.f32.xlu0 %v111_v14  ;;  %115 = vadd.xlane.f32.xlu1 %v114_v15  ;;  %v1675_v15 = vld [vmem:[#allocation4 + $0x28] sm:$0xff] }
  0x35   :  { %1309 = vmatpush3.msra.mxu1 %v87_v5  ;;  %v68_v5 = vld [vmem:[#allocation4] sm:$0xff] }
  0x36   :  { %1310 = vmatprep.subr.mxu1 %v86_v1 }
  0x37   :  { %1311 = vmatpush3.msra.mxu1 %v86_v1 }
  0x38   :  { %398 = vadd.xlane.f32.xlu0 %v397_v18  ;;  %401 = vadd.xlane.f32.xlu1 %v400_v19 }
  0x39   :  { %1312 = vmatprep.subr.mxu1 %v85_v2 }
  0x3a   :  { %1313 = vmatpush3.msra.mxu1 %v85_v2 }
  0x3b   :  { %1314 = vmatprep.subr.mxu1 %v84_v0 }
  0x3c   :  { %404 = vadd.xlane.f32.xlu0 %v403_v22  ;;  %407 = vadd.xlane.f32.xlu1 %v406_v23 }
  0x3d   :  { %1315 = vmatpush3.msra.mxu1 %v84_v0  ;;  %v158_v0 = vlaneseq }
  0x3e   :  { %1328 = vmatprep.subr.mxu1 %v1621_v28 }
  0x3f   :  { %v1666_v1 = vshrl.u32 %v158_v0, 7 }
  0x40   :  { %410 = vadd.xlane.f32.xlu0 %v409_v26  ;;  %413 = vadd.xlane.f32.xlu1 %v412_v27 }
  0x41   :  { %v1669_v2 = vsub.s32 0, %v1666_v1 }
  0x44   :  { %416 = vadd.xlane.f32.xlu0 %v415_v30  ;;  %419 = vadd.xlane.f32.xlu1 %v418_v31  ;;  %v74_v31 = vld [vmem:[#allocation4 + $0x30] sm:$0xff] }
  0xb1   :  { %v95_v32 = vpop.xlane.xlu0 %94  ;;  %v101_v33 = vpop.xlane.xlu1 %100 }
  0xb2   :  { %v1633_v34 = vmul.f32 0.0625, %v95_v32  ;;  %v1638_v38 = vmul.f32 0.0625, %v101_v33  ;;  %v1677_v33 = vld [vmem:[#allocation4 + $0x38] sm:$0xff] }
  0xb4   :  { %126 = vxpose.xlu0.b32.start [1/8] (short) (narrow) %v1633_v34, 8 }
  0xb5   :  { %v98_v35 = vpop.xlane.xlu0 %97  ;;  %v104_v36 = vpop.xlane.xlu1 %103 }
  0xb6   :  { %v1636_v37 = vmul.f32 0.0625, %v98_v35  ;;  %v121_v41 = vmul.f32 0.0625, %v104_v36 }
  0xb8   :  { %127 = vxpose.xlu0.b32.cont [2/8] (short) (narrow) %v1636_v37, 8 }
  0xb9   :  { %v107_v39 = vpop.xlane.xlu0 %106  ;;  %v110_v40 = vpop.xlane.xlu1 %109 }
  0xba   :  { %v122_v44 = vmul.f32 0.0625, %v107_v39  ;;  %v123_v48 = vmul.f32 0.0625, %v110_v40 }
  0xbc   :  { %128 = vxpose.xlu0.b32.cont [3/8] (short) (narrow) %v1638_v38, 8 }
  0xbd   :  { %v113_v42 = vpop.xlane.xlu0 %112  ;;  %v116_v43 = vpop.xlane.xlu1 %115 }
  0xbe   :  { %v124_v51 = vmul.f32 0.0625, %v113_v42  ;;  %v125_v54 = vmul.f32 0.0625, %v116_v43 }
  0xc0   :  { %129 = vxpose.xlu0.b32.cont [4/8] (short) (narrow) %v121_v41, 8 }
  0xc1   :  { %v399_v45 = vpop.xlane.xlu0 %398  ;;  %v402_v46 = vpop.xlane.xlu1 %401 }
  0xc2   :  { %v1642_v47 = vmul.f32 0.0625, %v399_v45  ;;  %v1645_v49 = vmul.f32 0.0625, %v402_v46 }
  0xc4   :  { %130 = vxpose.xlu0.b32.cont [5/8] (short) (narrow) %v122_v44, 8  ;;  %429 = vxpose.xlu1.b32.start [1/8] (short) (narrow) %v1642_v47, 8 }
  0xc5   :  { %v405_v50 = vpop.xlane.xlu0 %404  ;;  %v408_v53 = vpop.xlane.xlu1 %407 }
  0xc6   :  { %v1648_v52 = vmul.f32 0.0625, %v405_v50  ;;  %v1651_v55 = vmul.f32 0.0625, %v408_v53 }
  0xc8   :  { %131 = vxpose.xlu0.b32.cont [6/8] (short) (narrow) %v123_v48, 8  ;;  %430 = vxpose.xlu1.b32.cont [2/8] (short) (narrow) %v1645_v49, 8 }
  0xc9   :  { %v411_v56 = vpop.xlane.xlu0 %410  ;;  %v414_v58 = vpop.xlane.xlu1 %413 }
  0xca   :  { %v1654_v57 = vmul.f32 0.0625, %v411_v56  ;;  %v1657_v59 = vmul.f32 0.0625, %v414_v58 }
  0xcc   :  { %132 = vxpose.xlu0.b32.cont [7/8] (short) (narrow) %v124_v51, 8  ;;  %431 = vxpose.xlu1.b32.cont [3/8] (short) (narrow) %v1648_v52, 8 }
  0xcd   :  { %v417_v60 = vpop.xlane.xlu0 %416  ;;  %v420_v62 = vpop.xlane.xlu1 %419 }
  0xce   :  { %v1660_v61 = vmul.f32 0.0625, %v417_v60  ;;  %v1663_v63 = vmul.f32 0.0625, %v420_v62 }
  0xd0   :  { %133 = vxpose.xlu0.b32.end [8/8] (short) (narrow) %v125_v54, 8  ;;  %432 = vxpose.xlu1.b32.cont [4/8] (short) (narrow) %v1651_v55, 8 }
  0xd4   :  { %433 = vxpose.xlu1.b32.cont [5/8] (short) (narrow) %v1654_v57, 8 }
  0xd8   :  { %434 = vxpose.xlu1.b32.cont [6/8] (short) (narrow) %v1657_v59, 8 }
  0xdc   :  { %435 = vxpose.xlu1.b32.cont [7/8] (short) (narrow) %v1660_v61, 8 }
  0xe0   :  { %436 = vxpose.xlu1.b32.end [8/8] (short) (narrow) %v1663_v63, 8 }
 0x130   :  { %v142_v3 = vpop.trf.xlu0 }
 0x131   :  { %v161_v4 = vrot.slane %v142_v3, %v1669_v2 }
 0x133   :  { %v162_v9 = vsub.f32 %v1633_v34, %v161_v4  ;;  %v163_v10 = vsub.f32 %v1636_v37, %v161_v4  ;;  %v164_v11 = vsub.f32 %v1638_v38, %v161_v4  ;;  %v165_v12 = vsub.f32 %v121_v41, %v161_v4 }
 0x134   :  { %v166_v14 = vsub.f32 %v122_v44, %v161_v4  ;;  %v167_v18 = vsub.f32 %v123_v48, %v161_v4  ;;  %v168_v19 = vsub.f32 %v124_v51, %v161_v4  ;;  %v169_v22 = vsub.f32 %v125_v54, %v161_v4 }
 0x135   :  { %v170_v23 = vmul.f32 %v162_v9, %v68_v5  ;;  %v171_v26 = vmul.f32 %v163_v10, %v69_v6  ;;  %v172_v27 = vmul.f32 %v164_v11, %v70_v7  ;;  %v173_v30 = vmul.f32 %v165_v12, %v71_v8 }
 0x136   :  { %v174_v32 = vmul.f32 %v166_v14, %v72_v13  ;;  %v1680_v36 = vmul.f32 %v167_v18, %v1675_v15  ;;  %v1682_v38 = vmul.f32 %v168_v19, %v74_v31  ;;  %v1685_v42 = vmul.f32 %v169_v22, %v1677_v33 }
 0x137   :  { %v178_v34 = vand.u32 2147483647, %v170_v23  ;;  %v179_v35 = vand.u32 2147483647, %v171_v26  ;;  %v180_v37 = vand.u32 2147483647, %v172_v27 }
 0x138   :  { %v181_v41 = vand.u32 2147483647, %v173_v30  ;;  %v182_v44 = vand.u32 2147483647, %v174_v32  ;;  %v183_v46 = vand.u32 2147483647, %v1680_v36 }
 0x139   :  { %v186_v39 = vadd.f32 1.0, %v178_v34  ;;  %v187_v40 = vadd.f32 1.0, %v179_v35  ;;  %v188_v43 = vadd.f32 1.0, %v180_v37  ;;  %v184_v50 = vand.u32 2147483647, %v1682_v38 }
 0x13a   :  { %v189_v45 = vadd.f32 1.0, %v181_v41  ;;  %v190_v48 = vadd.f32 1.0, %v182_v44  ;;  %v1689_v51 = vadd.f32 1.0, %v183_v46  ;;  %v185_v53 = vand.u32 2147483647, %v1685_v42 }
 0x13b   :  { %1365 = vrcp.f32 %v186_v39  ;;  %v1692_v54 = vadd.f32 1.0, %v184_v50  ;;  %v226_v9 = vmul.f32 0.17677669, %v170_v23  ;;  %v228_v22 = vmul.f32 0.17677669, %v172_v27 }
 0x13c   :  { %1367 = vrcp.f32 %v187_v40  ;;  %v1694_v56 = vadd.f32 1.0, %v185_v53  ;;  %v229_v23 = vmul.f32 0.17677669, %v173_v30 }
 0x13d   :  { %1369 = vrcp.f32 %v188_v43 }
 0x13e   :  { %1371 = vrcp.f32 %v189_v45 }
 0x13f   :  { %1373 = vrcp.f32 %v190_v48 }
 0x140   :  { %v445_v58 = vpop.trf.xlu1  ;;  %1375 = vrcp.f32 %v1689_v51 }
 0x141   :  { %v464_v60 = vrot.slane %v445_v58, %v1669_v2  ;;  %1377 = vrcp.f32 %v1692_v54 }
 0x142   :  { %1379 = vrcp.f32 %v1694_v56 }
 0x143   :  { %v465_v62 = vsub.f32 %v1642_v47, %v464_v60  ;;  %v466_v0 = vsub.f32 %v1645_v49, %v464_v60  ;;  %v467_v3 = vsub.f32 %v1648_v52, %v464_v60  ;;  %v468_v4 = vsub.f32 %v1651_v55, %v464_v60 }
 0x144   :  { %v469_v10 = vsub.f32 %v1654_v57, %v464_v60  ;;  %v470_v11 = vsub.f32 %v1657_v59, %v464_v60  ;;  %v471_v12 = vsub.f32 %v1660_v61, %v464_v60  ;;  %v227_v49 = vmul.f32 0.17677669, %v171_v26 }
 0x145   :  { %v1707_v14 = vmul.f32 %v465_v62, %v68_v5  ;;  %v1709_v18 = vmul.f32 %v466_v0, %v69_v6  ;;  %v1711_v19 = vmul.f32 %v467_v3, %v70_v7  ;;  %v1713_v47 = vmul.f32 %v468_v4, %v71_v8  ;;  %v1744_v3 = vld [vmem:[#allocation7] sm:$0xff] }
 0x146   :  { %v1715_v52 = vmul.f32 %v469_v10, %v72_v13  ;;  %v472_v55 = vsub.f32 %v1663_v63, %v464_v60  ;;  %v230_v5 = vmul.f32 0.17677669, %v174_v32  ;;  %v1722_v7 = vmul.f32 %v470_v11, %v1675_v15 }
 0x147   :  { %v481_v57 = vand.u32 2147483647, %v1707_v14  ;;  %v482_v59 = vand.u32 2147483647, %v1709_v18  ;;  %v483_v6 = vand.u32 2147483647, %v1711_v19  ;;  %v1724_v8 = vmul.f32 %v471_v12, %v74_v31 }
 0x148   :  { %v1366_v61 = vpop.eup %1365  ;;  %v484_v34 = vand.u32 2147483647, %v1713_v47  ;;  %v485_v32 = vand.u32 2147483647, %v1715_v52  ;;  %v1735_v41 = vmul.f32 %v472_v55, %v1677_v33 }
 0x149   :  { %v1368_v26 = vpop.eup %1367  ;;  %v202_v13 = vmul.f32 %v1366_v61, %v186_v39  ;;  %v1726_v27 = vadd.f32 1.0, %v481_v57  ;;  %v1728_v63 = vadd.f32 1.0, %v482_v59  ;;  %v1731_v37 = vadd.f32 1.0, %v483_v6 }
 0x14a   :  { %v1370_v35 = vpop.eup %1369  ;;  %v203_v30 = vmul.f32 %v1368_v26, %v187_v40  ;;  %v1738_v44 = vadd.f32 1.0, %v484_v34  ;;  %v1741_v40 = vadd.f32 1.0, %v485_v32 }
 0x14b   :  { %v1372_v15 = vpop.eup %1371  ;;  %v210_v31 = vsub.f32 2.0, %v202_v13  ;;  %1381 = vrcp.f32 %v1726_v27  ;;  %v204_v39 = vmul.f32 %v1370_v35, %v188_v43 }
 0x14c   :  { %v1374_v46 = vpop.eup %1373  ;;  %v211_v50 = vsub.f32 2.0, %v203_v30  ;;  %1383 = vrcp.f32 %v1728_v63  ;;  %v205_v53 = vmul.f32 %v1372_v15, %v189_v45  ;;  %v1748_v45 = vld [vmem:[#allocation7 + $0x8] sm:$0xff] }
 0x14d   :  { %v1376_v58 = vpop.eup %1375  ;;  %v218_v60 = vmul.f32 %v1366_v61, %v210_v31  ;;  %v212_v62 = vsub.f32 2.0, %v204_v39  ;;  %v206_v0 = vmul.f32 %v1374_v46, %v190_v48  ;;  %1385 = vrcp.f32 %v1731_v37  ;;  %v1751_v61 = vld [vmem:[#allocation7 + $0x10] sm:$0xff] }
 0x14e   :  { %v1378_v33 = vpop.eup %1377  ;;  %v219_v4 = vmul.f32 %v1368_v26, %v211_v50  ;;  %v213_v43 = vsub.f32 2.0, %v205_v53  ;;  %v207_v10 = vmul.f32 %v1376_v58, %v1689_v51  ;;  %1387 = vrcp.f32 %v1738_v44 }
 0x14f   :  { %v1380_v11 = vpop.eup %1379  ;;  %v234_v12 = vmul.f32 %v226_v9, %v218_v60  ;;  %v220_v55 = vmul.f32 %v1370_v35, %v212_v62  ;;  %v214_v57 = vsub.f32 2.0, %v206_v0  ;;  %v208_v59 = vmul.f32 %v1378_v33, %v1692_v54  ;;  %v1774_v62 = vld [vmem:[#allocation7 + $0x28] sm:$0xff] }
 0x150   :  { %v235_v48 = vmul.f32 %v227_v49, %v219_v4  ;;  %v221_v6 = vmul.f32 %v1372_v15, %v213_v43  ;;  %v215_v13 = vsub.f32 2.0, %v207_v10  ;;  %v209_v26 = vmul.f32 %v1380_v11, %v1694_v56  ;;  %v1758_v49 = vld [vmem:[#allocation7 + $0x18] sm:$0xff]  ;;  %v1762_v56 = vld [vmem:[#allocation7 + $0x20] sm:$0xff]  ;;  %v1781_v4 = vld [vmem:[#allocation7 + $0x30] sm:$0xff] }
 0x151   :  { %v242_v34 = vadd.f32 %v234_v12, %v1744_v3  ;;  %v236_v51 = vmul.f32 %v228_v22, %v220_v55  ;;  %v222_v30 = vmul.f32 %v1374_v46, %v214_v57  ;;  %v216_v32 = vsub.f32 2.0, %v208_v59 }
 0x152   :  { %v243_v9 = vadd.f32 %v235_v48, %v1748_v45  ;;  %v237_v31 = vmul.f32 %v229_v23, %v221_v6  ;;  %v223_v39 = vmul.f32 %v1376_v58, %v215_v13  ;;  %v217_v35 = vsub.f32 2.0, %v209_v26  ;;  %v1798_v6 = vld [vmem:[#allocation7 + $0x38] sm:$0xff] }
 0x153   :  { %1316 = vmatprep.mubr.msk.f32.mxu1 %vm250_vm1, %v242_v34  ;;  %v244_v54 = vadd.f32 %v236_v51, %v1751_v61  ;;  %v238_v15 = vmul.f32 %v230_v5, %v222_v30  ;;  %v224_v50 = vmul.f32 %v1378_v33, %v216_v32  ;;  %1389 = vrcp.f32 %v1741_v40 }
 0x154   :  { %1317 = vmatmul.mubr.msk.f32.vlgmr.msra.gmra.mxu1 %vm250_vm1, %v243_v9  ;;  %v231_v22 = vmul.f32 0.17677669, %v1680_v36  ;;  %v232_v23 = vmul.f32 0.17677669, %v1682_v38  ;;  %v486_v46 = vand.u32 2147483647, %v1722_v7  ;;  %v245_v5 = vadd.f32 %v237_v31, %v1758_v49 }
 0x155   :  { %1319 = vmatprep.mubr.msk.f32.mxu1 %vm250_vm1, %v244_v54  ;;  %1329 = vmatpush3.msra.mxu1 %v1621_v28  ;;  %v225_v58 = vmul.f32 %v1380_v11, %v217_v35  ;;  %v487_v60 = vand.u32 2147483647, %v1724_v8  ;;  %v246_v36 = vadd.f32 %v238_v15, %v1762_v56  ;;  %v488_v38 = vand.u32 2147483647, %v1735_v41 }
 0x156   :  { %1330 = vmatprep.subr.mxu1 %v1626_v29  ;;  %v239_v53 = vmul.f32 %v231_v22, %v223_v39  ;;  %v240_v0 = vmul.f32 %v232_v23, %v224_v50  ;;  %v1776_v28 = vadd.f32 1.0, %v486_v46  ;;  %v233_v43 = vmul.f32 0.17677669, %v1685_v42 }
 0x157   :  { %1331 = vmatpush3.msra.mxu1 %v1626_v29  ;;  %v1784_v10 = vadd.f32 1.0, %v487_v60  ;;  %v1790_v12 = vadd.f32 1.0, %v488_v38  ;;  %v529_v51 = vmul.f32 0.17677669, %v1707_v14  ;;  %v531_v39 = vmul.f32 0.17677669, %v1711_v19 }
 0x158   :  { %v1382_v33 = vpop.eup %1381  ;;  %1320 = vmatmul.mubr.msk.f32.gmra.mxu1 %vm250_vm1, %v245_v5  ;;  %1332 = vmatprep.subr.mxu1 %v1612_v25  ;;  %1391 = vrcp.f32 %v1776_v28  ;;  %v247_v42 = vadd.f32 %v239_v53, %v1774_v62  ;;  %v241_v59 = vmul.f32 %v233_v43, %v225_v58 }
 0x159   :  { %v1384_v29 = vpop.eup %1383  ;;  %v505_v11 = vmul.f32 %v1382_v33, %v1726_v27  ;;  %1322 = vmatprep.mubr.msk.f32.mxu1 %vm250_vm1, %v246_v36  ;;  %1333 = vmatpush3.msra.mxu1 %v1612_v25  ;;  %1393 = vrcp.f32 %v1784_v10  ;;  %v248_v25 = vadd.f32 %v240_v0, %v1781_v4 }
 0x15a   :  { %v1386_v55 = vpop.eup %1385  ;;  %v506_v57 = vmul.f32 %v1384_v29, %v1728_v63  ;;  %1334 = vmatprep.subr.mxu1 %v1607_v24  ;;  %1395 = vrcp.f32 %v1790_v12  ;;  %v249_v32 = vadd.f32 %v241_v59, %v1798_v6 }
 0x15b   :  { %v1388_v48 = vpop.eup %1387  ;;  %v513_v27 = vsub.f32 2.0, %v505_v11  ;;  %1335 = vmatpush3.msra.mxu1 %v1607_v24  ;;  %v507_v13 = vmul.f32 %v1386_v55, %v1731_v37  ;;  %v530_v37 = vmul.f32 0.17677669, %v1709_v18  ;;  %v532_v18 = vmul.f32 0.17677669, %v1713_v47 }
 0x15c   :  { %v514_v63 = vsub.f32 2.0, %v506_v57  ;;  %1323 = vmatmul.mubr.msk.f32.gmra.mxu1 %vm250_vm1, %v247_v42  ;;  %1336 = vmatprep.subr.mxu1 %v1598_v21  ;;  %v508_v26 = vmul.f32 %v1388_v48, %v1738_v44  ;;  %v533_v47 = vmul.f32 0.17677669, %v1715_v52  ;;  %v708_v57 = vld [vmem:[#allocation9 + $0x8] sm:$0xff] }
 0x15d   :  { %v521_v34 = vmul.f32 %v1382_v33, %v513_v27  ;;  %1325 = vmatprep.mubr.msk.f32.mxu1 %vm250_vm1, %v248_v25  ;;  %1337 = vmatpush3.msra.mxu1 %v1598_v21  ;;  %v515_v24 = vsub.f32 2.0, %v507_v13 }
 0x15e   :  { %v522_v30 = vmul.f32 %v1384_v29, %v514_v63  ;;  %1338 = vmatprep.subr.mxu1 %v1593_v20  ;;  %v516_v9 = vsub.f32 2.0, %v508_v26  ;;  %v536_v29 = vmul.f32 0.17677669, %v1735_v41  ;;  %v707_v41 = vld [vmem:[#allocation9] sm:$0xff] }
 0x15f   :  { %v537_v31 = vmul.f32 %v529_v51, %v521_v34  ;;  %1339 = vmatpush3.msra.mxu1 %v1593_v20  ;;  %v523_v44 = vmul.f32 %v1386_v55, %v515_v24  ;;  %v710_v55 = vld [vmem:[#allocation9 + $0x18] sm:$0xff] }
 0x160   :  { %v1390_v14 = vpop.eup %1389  ;;  %v538_v35 = vmul.f32 %v530_v37, %v522_v30  ;;  %1326 = vmatmul.mubr.msk.f32.gmra.mxu1 %vm250_vm1, %v249_v32  ;;  %1340 = vmatprep.subr.mxu1 %v1584_v17  ;;  %v524_v21 = vmul.f32 %v1388_v48, %v516_v9 }
 0x161   :  { %v545_v54 = vadd.f32 %v537_v31, %v1744_v3  ;;  %1341 = vmatpush3.msra.mxu1 %v1584_v17  ;;  %v539_v15 = vmul.f32 %v531_v39, %v523_v44  ;;  %v509_v50 = vmul.f32 %v1390_v14, %v1741_v40  ;;  %787 = vmatprep.subr.mxu0 %v710_v55 }
 0x162   :  { %v546_v20 = vadd.f32 %v538_v35, %v1748_v45  ;;  %1342 = vmatprep.subr.mxu1 %v1579_v16  ;;  %v540_v19 = vmul.f32 %v532_v18, %v524_v21 }
 0x163   :  { %1343 = vmatpush3.msra.mxu1 %v1579_v16  ;;  %1344 = vmatprep.mubr.msk.f32.mxu1 %vm250_vm1, %v545_v54  ;;  %v547_v22 = vadd.f32 %v539_v15, %v1751_v61  ;;  %v517_v23 = vsub.f32 2.0, %v509_v50 }
 0x164   :  { %1345 = vmatmul.mubr.msk.f32.vlgmr.msra.gmra.mxu1 %vm250_vm1, %v546_v20  ;;  %v548_v3 = vadd.f32 %v540_v19, %v1758_v49  ;;  %v534_v49 = vmul.f32 0.17677669, %v1722_v7 }
 0x165   :  { %1347 = vmatprep.mubr.msk.f32.mxu1 %vm250_vm1, %v547_v22  ;;  %v525_v17 = vmul.f32 %v1390_v14, %v517_v23  ;;  %v1392_v40 = vpop.eup %1391 }
 0x166   :  { %v1394_v45 = vpop.eup %1393  ;;  %v510_v5 = vmul.f32 %v1392_v40, %v1776_v28  ;;  %v535_v28 = vmul.f32 0.17677669, %v1724_v8  ;;  %v709_v8 = vld [vmem:[#allocation9 + $0x10] sm:$0xff] }
 0x167   :  { %v541_v46 = vmul.f32 %v533_v47, %v525_v17  ;;  %v1396_v16 = vpop.eup %1395  ;;  %v511_v61 = vmul.f32 %v1394_v45, %v1784_v10  ;;  %788 = vmatpush1.msra.mxu0 %v709_v8  ;;  %v1934_v8 = vld [vmem:[%s2012_s4 + $0x48] sm:$0xff] }
 0x168   :  { %1348 = vmatmul.mubr.msk.f32.gmra.mxu1 %vm250_vm1, %v548_v3  ;;  %v518_v58 = vsub.f32 2.0, %v510_v5  ;;  %v512_v60 = vmul.f32 %v1396_v16, %v1790_v12  ;;  %789 = vmatprep.subr.mxu0 %v708_v57 }
 0x169   :  { %v549_v53 = vadd.f32 %v541_v46, %v1762_v56  ;;  %v519_v36 = vsub.f32 2.0, %v511_v61  ;;  %790 = vmatpush1.msra.mxu0 %v707_v41 }
 0x16a   :  { %v526_v52 = vmul.f32 %v1392_v40, %v518_v58  ;;  %v520_v0 = vsub.f32 2.0, %v512_v60 }
 0x16b   :  { %1350 = vmatprep.mubr.msk.f32.mxu1 %vm250_vm1, %v549_v53  ;;  %v527_v38 = vmul.f32 %v1394_v45, %v519_v36 }
 0x16c   :  { %v542_v33 = vmul.f32 %v534_v49, %v526_v52  ;;  %v528_v43 = vmul.f32 %v1396_v16, %v520_v0 }
 0x16d   :  { %v543_v10 = vmul.f32 %v535_v28, %v527_v38  ;;  %v1899_v38 = vld [vmem:[%s2012_s4 + $0x78] sm:$0xff]  ;;  %v1904_v28 = vld [vmem:[%s2012_s4 + $0x70] sm:$0xff] }
 0x16e   :  { %v550_v56 = vadd.f32 %v542_v33, %v1774_v62  ;;  %v544_v11 = vmul.f32 %v536_v29, %v528_v43  ;;  %v1490_v62 = vmov 0.0   ;;  %v1909_v33 = vld [vmem:[%s2012_s4 + $0x68] sm:$0xff]  ;;  %v1914_v29 = vld [vmem:[%s2012_s4 + $0x60] sm:$0xff] }
 0x16f   :  { %v551_v12 = vadd.f32 %v543_v10, %v1781_v4  ;;  %823 = vmatprep.mubr.f32.mxu0 %v1490_v62 }
 0x170   :  { %1351 = vmatmul.mubr.msk.f32.gmra.mxu1 %vm250_vm1, %v550_v56  ;;  %v552_v7 = vadd.f32 %v544_v11, %v1798_v6  ;;  %v1920_v56 = vld [vmem:[%s2012_s4 + $0x58] sm:$0xff] }
 0x171   :  { %1353 = vmatprep.mubr.msk.f32.mxu1 %vm250_vm1, %v551_v12 }
 0x174   :  { %1354 = vmatmul.mubr.msk.f32.gmra.mxu1 %vm250_vm1, %v552_v7  ;;  %v1928_v7 = vld [vmem:[%s2012_s4 + $0x50] sm:$0xff] }
 0x175   :  { %1083 = vmatprep.mubr.f32.mxu1 %v1490_v62 }
 0x214   :  { %v1318_v4 = vpop.f32.mrf.mxu1 }
 0x215   :  { %381 = vst.msk [vmem:[#allocation2 + $0x8] sm:$0xff] %vm92_vm0, %v1318_v4  ;;  %v1942_v4 = vld [vmem:[%s2012_s4 + $0x40] sm:$0xff] }
 0x216   :  { %v341_v42 = vpop.f32.mrf.mxu1 }
 0x217   :  { %380 = vst.msk [vmem:[#allocation2] sm:$0xff] %vm92_vm0, %v341_v42 }
 0x218   :  { %v1321_v59 = vpop.f32.mrf.mxu1 }
 0x219   :  { %383 = vst.msk [vmem:[#allocation2 + $0x18] sm:$0xff] %vm92_vm0, %v1321_v59  ;;  %v1948_v59 = vld [vmem:[%s2012_s4 + $0x38] sm:$0xff] }
 0x21a   :  { %v351_v48 = vpop.f32.mrf.mxu1 }
 0x21b   :  { %382 = vst.msk [vmem:[#allocation2 + $0x10] sm:$0xff] %vm92_vm0, %v351_v48 }
 0x21c   :  { %v1324_v27 = vpop.f32.mrf.mxu1  ;;  %v692_v26 = vld [vmem:[#allocation2 + $0x8] sm:$0xff] }
 0x21d   :  { %385 = vst.msk [vmem:[#allocation2 + $0x28] sm:$0xff] %vm92_vm0, %v1324_v27 }
 0x21e   :  { %v361_v25 = vpop.f32.mrf.mxu1  ;;  %v691_v6 = vld [vmem:[#allocation2] sm:$0xff] }
 0x21f   :  { %384 = vst.msk [vmem:[#allocation2 + $0x20] sm:$0xff] %vm92_vm0, %v361_v25  ;;  %1250 = vmatmul.mubr.msk.f32.vlgmr.msra.gmra.mxu0 %vm92_vm0, %v691_v6  ;;  %v958_v25 = vld [vmem:[%s2012_s4 + $0x30] sm:$0xff] }
 0x220   :  { %v1327_v13 = vpop.f32.mrf.mxu1  ;;  %829 = vmatprep.mubr.f32.mxu0 %v1490_v62  ;;  %v694_v32 = vld [vmem:[#allocation2 + $0x18] sm:$0xff] }
 0x221   :  { %387 = vst.msk [vmem:[#allocation2 + $0x38] sm:$0xff] %vm92_vm0, %v1327_v13  ;;  %v957_v13 = vld [vmem:[%s2012_s4 + $0x28] sm:$0xff] }
 0x222   :  { %v371_v63 = vpop.f32.mrf.mxu1  ;;  %v693_v24 = vld [vmem:[#allocation2 + $0x10] sm:$0xff] }
 0x223   :  { %386 = vst.msk [vmem:[#allocation2 + $0x30] sm:$0xff] %vm92_vm0, %v371_v63  ;;  %1251 = vmatmul.mubr.msk.f32.gmra.mxu0 %vm92_vm0, %v692_v26 }
 0x224   :  { %v1346_v34 = vpop.f32.mrf.mxu1  ;;  %835 = vmatprep.mubr.f32.mxu0 %v1490_v62  ;;  %v696_v44 = vld [vmem:[#allocation2 + $0x28] sm:$0xff] }
 0x225   :  { %684 = vst.msk [vmem:[#allocation2 + $0x48] sm:$0xff] %vm92_vm0, %v1346_v34  ;;  %v956_v34 = vld [vmem:[%s2012_s4 + $0x20] sm:$0xff] }
 0x226   :  { %v643_v51 = vpop.f32.mrf.mxu1  ;;  %v695_v9 = vld [vmem:[#allocation2 + $0x20] sm:$0xff] }
 0x227   :  { %683 = vst.msk [vmem:[#allocation2 + $0x40] sm:$0xff] %vm92_vm0, %v643_v51  ;;  %1252 = vmatmul.mubr.msk.f32.gmra.mxu0 %vm92_vm0, %v693_v24  ;;  %v955_v24 = vld [vmem:[%s2012_s4 + $0x18] sm:$0xff] }
 0x228   :  { %v1349_v30 = vpop.f32.mrf.mxu1  ;;  %841 = vmatprep.mubr.f32.mxu0 %v1490_v62  ;;  %v698_v18 = vld [vmem:[#allocation2 + $0x38] sm:$0xff] }
 0x229   :  { %686 = vst.msk [vmem:[#allocation2 + $0x58] sm:$0xff] %vm92_vm0, %v1349_v30 }
 0x22a   :  { %v653_v37 = vpop.f32.mrf.mxu1  ;;  %v697_v35 = vld [vmem:[#allocation2 + $0x30] sm:$0xff] }
 0x22b   :  { %685 = vst.msk [vmem:[#allocation2 + $0x50] sm:$0xff] %vm92_vm0, %v653_v37  ;;  %1253 = vmatmul.mubr.msk.f32.gmra.mxu0 %vm92_vm0, %v694_v32  ;;  %v954_v32 = vld [vmem:[%s2012_s4 + $0x10] sm:$0xff] }
 0x22c   :  { %847 = vmatprep.mubr.f32.mxu0 %v1490_v62  ;;  %v700_v15 = vld [vmem:[#allocation2 + $0x48] sm:$0xff] }
 0x22e   :  { %v699_v54 = vld [vmem:[#allocation2 + $0x40] sm:$0xff] }
 0x22f   :  { %1254 = vmatmul.mubr.msk.f32.gmra.mxu0 %vm92_vm0, %v695_v9 }
 0x230   :  { %853 = vmatprep.mubr.f32.mxu0 %v1490_v62  ;;  %v1352_v31 = vpop.f32.mrf.mxu1  ;;  %v702_v20 = vld [vmem:[#allocation2 + $0x58] sm:$0xff] }
 0x231   :  { %688 = vst.msk [vmem:[#allocation2 + $0x68] sm:$0xff] %vm92_vm0, %v1352_v31  ;;  %v953_v31 = vld [vmem:[%s2012_s4 + $0x8] sm:$0xff] }
 0x232   :  { %v663_v39 = vpop.f32.mrf.mxu1  ;;  %v701_v50 = vld [vmem:[#allocation2 + $0x50] sm:$0xff] }
 0x233   :  { %1255 = vmatmul.mubr.msk.f32.gmra.mxu0 %vm92_vm0, %v696_v44  ;;  %687 = vst.msk [vmem:[#allocation2 + $0x60] sm:$0xff] %vm92_vm0, %v663_v39 }
 0x234   :  { %859 = vmatprep.mubr.f32.mxu0 %v1490_v62  ;;  %v1355_v14 = vpop.f32.mrf.mxu1 }
 0x235   :  { %690 = vst.msk [vmem:[#allocation2 + $0x78] sm:$0xff] %vm92_vm0, %v1355_v14  ;;  %v952_v14 = vld [vmem:[%s2012_s4] sm:$0xff] }
 0x236   :  { %v673_v21 = vpop.f32.mrf.mxu1 }
 0x237   :  { %1256 = vmatmul.mubr.msk.f32.gmra.mxu0 %vm92_vm0, %v697_v35  ;;  %689 = vst.msk [vmem:[#allocation2 + $0x70] sm:$0xff] %vm92_vm0, %v673_v21 }
 0x238   :  { %865 = vmatprep.mubr.f32.mxu0 %v1490_v62  ;;  %v704_v22 = vld [vmem:[#allocation2 + $0x68] sm:$0xff] }
 0x23a   :  { %v703_v19 = vld [vmem:[#allocation2 + $0x60] sm:$0xff] }
 0x23b   :  { %1257 = vmatmul.mubr.msk.f32.gmra.mxu0 %vm92_vm0, %v698_v18 }
 0x23c   :  { %871 = vmatprep.mubr.f32.mxu0 %v1490_v62  ;;  %v706_v17 = vld [vmem:[#allocation2 + $0x78] sm:$0xff] }
 0x23e   :  { %v705_v23 = vld [vmem:[#allocation2 + $0x70] sm:$0xff] }
 0x23f   :  { %1258 = vmatmul.mubr.msk.f32.gmra.mxu0 %vm92_vm0, %v699_v54 }
 0x240   :  { %877 = vmatprep.mubr.f32.mxu0 %v1490_v62 }
 0x243   :  { %1259 = vmatmul.mubr.msk.f32.gmra.mxu0 %vm92_vm0, %v700_v15 }
 0x244   :  { %883 = vmatprep.mubr.f32.mxu0 %v1490_v62 }
 0x247   :  { %1260 = vmatmul.mubr.msk.f32.gmra.mxu0 %vm92_vm0, %v701_v50 }
 0x248   :  { %889 = vmatprep.mubr.f32.mxu0 %v1490_v62 }
 0x24b   :  { %1261 = vmatmul.mubr.msk.f32.gmra.mxu0 %vm92_vm0, %v702_v20  ;;  %v968_v20 = vld [vmem:[%s2013_s5] sm:$0xff] }
 0x24c   :  { %895 = vmatprep.mubr.f32.mxu0 %v1490_v62 }
 0x24f   :  { %1262 = vmatmul.mubr.msk.f32.gmra.mxu0 %vm92_vm0, %v703_v19 }
 0x250   :  { %901 = vmatprep.mubr.f32.mxu0 %v1490_v62 }
 0x253   :  { %1263 = vmatmul.mubr.msk.f32.gmra.mxu0 %vm92_vm0, %v704_v22 }
 0x254   :  { %907 = vmatprep.mubr.f32.mxu0 %v1490_v62 }
 0x257   :  { %1264 = vmatmul.mubr.msk.f32.gmra.mxu0 %vm92_vm0, %v705_v23 }
 0x258   :  { %913 = vmatprep.mubr.f32.mxu0 %v1490_v62 }
 0x25b   :  { %1265 = vmatmul.mubr.msk.f32.gmra.mxu0 %vm92_vm0, %v706_v17 }
 0x2df   :  { %v1892_v47 = vpop.f32.mrf.mxu0 }
 0x2e0   :  { %v989_v15 = vmul.f32 %v952_v14, %v1892_v47 }
 0x2e1   :  { %v1894_v40 = vpop.f32.mrf.mxu0 }
 0x2e2   :  { %v990_v54 = vmul.f32 %v953_v31, %v1894_v40 }
 0x2e3   :  { %v831_v3 = vpop.f32.mrf.mxu0 }
 0x2e4   :  { %v991_v21 = vmul.f32 %v954_v32, %v831_v3 }
 0x2e5   :  { %v833_v45 = vpop.f32.mrf.mxu0 }
 0x2e6   :  { %v992_v35 = vmul.f32 %v955_v24, %v833_v45 }
 0x2e7   :  { %v837_v46 = vpop.f32.mrf.mxu0 }
 0x2e8   :  { %v993_v44 = vmul.f32 %v956_v34, %v837_v46 }
 0x2e9   :  { %v839_v5 = vpop.f32.mrf.mxu0 }
 0x2ea   :  { %v994_v9 = vmul.f32 %v957_v13, %v839_v5 }
 0x2eb   :  { %v843_v16 = vpop.f32.mrf.mxu0 }
 0x2ec   :  { %v995_v30 = vmul.f32 %v958_v25, %v843_v16 }
 0x2ed   :  { %v845_v61 = vpop.f32.mrf.mxu0 }
 0x2ee   :  { %v996_v51 = vmul.f32 %v1948_v59, %v845_v61 }
 0x2ef   :  { %v849_v53 = vpop.f32.mrf.mxu0 }
 0x2f0   :  { %v997_v63 = vmul.f32 %v1942_v4, %v849_v53 }
 0x2f1   :  { %v851_v58 = vpop.f32.mrf.mxu0 }
 0x2f2   :  { %v998_v6 = vmul.f32 %v1934_v8, %v851_v58 }
 0x2f3   :  { %v855_v60 = vpop.f32.mrf.mxu0 }
 0x2f4   :  { %v999_v48 = vmul.f32 %v1928_v7, %v855_v60 }
 0x2f5   :  { %v857_v36 = vpop.f32.mrf.mxu0 }
 0x2f6   :  { %v1000_v42 = vmul.f32 %v1920_v56, %v857_v36 }
 0x2f7   :  { %v861_v52 = vpop.f32.mrf.mxu0 }
 0x2f8   :  { %v1001_v57 = vmul.f32 %v1914_v29, %v861_v52 }
 0x2f9   :  { %v863_v49 = vpop.f32.mrf.mxu0 }
 0x2fa   :  { %v1002_v55 = vmul.f32 %v1909_v33, %v863_v49 }
 0x2fb   :  { %v867_v0 = vpop.f32.mrf.mxu0 }
 0x2fc   :  { %v1003_v11 = vmul.f32 %v1904_v28, %v867_v0 }
 0x2fd   :  { %v869_v43 = vpop.f32.mrf.mxu0 }
 0x2fe   :  { %v1004_v10 = vmul.f32 %v1899_v38, %v869_v43 }
 0x2ff   :  { %v1923_v12 = vpop.f32.mrf.mxu0 }
 0x300   :  { %1035 = vmatprep.subr.mxu1 %v1004_v10  ;;  %v1114_v43 = vmul.f32 %v952_v14, %v1923_v12  ;;  %v1012_v10 = vsub.s32 1, %v1666_v1 }
 0x301   :  { %v1937_v41 = vpop.f32.mrf.mxu0  ;;  %1036 = vmatpush1.msra.mxu1 %v1003_v11 }
 0x302   :  { %1037 = vmatprep.subr.mxu1 %v1002_v55 }
 0x303   :  { %v1951_v27 = vpop.f32.mrf.mxu0  ;;  %1038 = vmatpush1.msra.mxu1 %v1001_v57 }
 0x304   :  { %1039 = vmatprep.subr.mxu1 %v1000_v42 }
 0x305   :  { %v881_v26 = vpop.f32.mrf.mxu0  ;;  %1040 = vmatpush1.msra.mxu1 %v999_v48 }
 0x306   :  { %1041 = vmatprep.subr.mxu1 %v998_v6 }
 0x307   :  { %v885_v37 = vpop.f32.mrf.mxu0  ;;  %1042 = vmatpush1.msra.mxu1 %v997_v63 }
 0x308   :  { %1043 = vmatprep.subr.mxu1 %v996_v51  ;;  %v1118_v0 = vmul.f32 %v956_v34, %v885_v37 }
 0x309   :  { %v887_v39 = vpop.f32.mrf.mxu0  ;;  %1044 = vmatpush1.msra.mxu1 %v995_v30 }
 0x30a   :  { %1045 = vmatprep.subr.mxu1 %v994_v9  ;;  %v1119_v49 = vmul.f32 %v957_v13, %v887_v39 }
 0x30b   :  { %v891_v18 = vpop.f32.mrf.mxu0  ;;  %1046 = vmatpush1.msra.mxu1 %v993_v44 }
 0x30c   :  { %1047 = vmatprep.subr.mxu1 %v992_v35  ;;  %v1120_v52 = vmul.f32 %v958_v25, %v891_v18 }
 0x30d   :  { %v893_v50 = vpop.f32.mrf.mxu0  ;;  %1048 = vmatpush1.msra.mxu1 %v991_v21 }
 0x30e   :  { %1049 = vmatprep.subr.mxu1 %v990_v54  ;;  %v1121_v36 = vmul.f32 %v1948_v59, %v893_v50 }
 0x30f   :  { %v897_v19 = vpop.f32.mrf.mxu0  ;;  %1050 = vmatpush1.msra.mxu1 %v989_v15 }
 0x310   :  { %1266 = vmatmul.mubr.msk.f32.vlgmr.msra.gmra.mxu1 %vm250_vm1, %v968_v20  ;;  %v1122_v60 = vmul.f32 %v1942_v4, %v897_v19 }
 0x311   :  { %v899_v22 = vpop.f32.mrf.mxu0  ;;  %1194 = vmatprep.mubr.f32.mxu1 %v1490_v62 }
 0x312   :  { %v1123_v58 = vmul.f32 %v1934_v8, %v899_v22 }
 0x313   :  { %v903_v23 = vpop.f32.mrf.mxu0 }
 0x314   :  { %v1124_v62 = vmul.f32 %v1928_v7, %v903_v23 }
 0x315   :  { %v905_v17 = vpop.f32.mrf.mxu0 }
 0x316   :  { %v1125_v53 = vmul.f32 %v1920_v56, %v905_v17 }
 0x317   :  { %v909_v40 = vpop.f32.mrf.mxu0 }
 0x318   :  { %v1126_v61 = vmul.f32 %v1914_v29, %v909_v40  ;;  %v969_v29 = vld [vmem:[%s2014_s6] sm:$0x3]  ;;  %s1457_s6 = scalar_lea.vmem %s1212_s11, 512 }
 0x319   :  { %v911_v3 = vpop.f32.mrf.mxu0  ;;  %v1009_v56 = vrot.slane %v969_v29, %v1669_v2  ;;  %v1013_v11 = vrot.slane %v969_v29, %v1012_v10  ;;  %p1458_p1 = scmp.ne.s32.totalorder %s1212_s11, %s1457_s6  ;;  %p1463_p3 = scmp.lt.s32.totalorder %s1457_s6, %s1457_s6 }
 0x31a   :  { %v1127_v16 = vmul.f32 %v1909_v33, %v911_v3  ;;  %v1115_v33 = vmul.f32 %v953_v31, %v1937_v41 }
 0x31b   :  { %v915_v45 = vpop.f32.mrf.mxu0  ;;  %p1464_p4 = por %p1463_p3, %p1462_p2 }
 0x31c   :  { %v1128_v5 = vmul.f32 %v1904_v28, %v915_v45  ;;  %v1116_v28 = vmul.f32 %v954_v32, %v1951_v27 }
 0x31d   :  { %v917_v47 = vpop.f32.mrf.mxu0  ;;  %p1465_p5 = pnand %p1464_p4, %p1458_p1 }
 0x31e   :  { %v1129_v46 = vmul.f32 %v1899_v38, %v917_v47  ;;  %v1117_v38 = vmul.f32 %v955_v24, %v881_v26 }
 0x320   :  { %1146 = vmatprep.subr.mxu1 %v1129_v46 }
 0x321   :  { %1147 = vmatpush1.msra.mxu1 %v1128_v5 }
 0x322   :  { %1148 = vmatprep.subr.mxu1 %v1127_v16 }
 0x323   :  { %1149 = vmatpush1.msra.mxu1 %v1126_v61 }
 0x324   :  { %1150 = vmatprep.subr.mxu1 %v1125_v53 }
 0x325   :  { %1151 = vmatpush1.msra.mxu1 %v1124_v62 }
 0x326   :  { %1152 = vmatprep.subr.mxu1 %v1123_v58 }
 0x327   :  { %1153 = vmatpush1.msra.mxu1 %v1122_v60 }
 0x328   :  { %1154 = vmatprep.subr.mxu1 %v1121_v36 }
 0x329   :  { %1155 = vmatpush1.msra.mxu1 %v1120_v52 }
 0x32a   :  { %1156 = vmatprep.subr.mxu1 %v1119_v49 }
 0x32b   :  { %1157 = vmatpush1.msra.mxu1 %v1118_v0 }
 0x32c   :  { %1158 = vmatprep.subr.mxu1 %v1117_v38 }
 0x32d   :  { %1159 = vmatpush1.msra.mxu1 %v1116_v28 }
 0x32e   :  { %1160 = vmatprep.subr.mxu1 %v1115_v33 }
 0x32f   :  { %1161 = vmatpush1.msra.mxu1 %v1114_v43 }
 0x330   :  { %1267 = vmatmul.mubr.msk.f32.vlgmr.msra.gmra.mxu1 %vm250_vm1, %v968_v20 }
 0x3d0   :  { %v1085_v7 = vpop.f32.mrf.mxu1 }
 0x3d1   :  { %v1086_v55 = vadd.f32 %v1085_v7, %v1009_v56 }
 0x3d2   :  { %v1087_v8 = vpop.f32.mrf.mxu1 }
 0x3d3   :  { %1093 = vst [vmem:[#allocation10] sm:$0xff] %v1086_v55  ;;  %v1088_v57 = vadd.f32 %v1087_v8, %v1013_v11 }
 0x3d5   :  { %1094 = vst [vmem:[#allocation10 + $0x8] sm:$0xff] %v1088_v57 }
 0x3f0   :  { %v1196_v12 = vpop.f32.mrf.mxu1 }
 0x3f1   :  { %v1197_v41 = vadd.f32 %v1196_v12, %v1009_v56 }
 0x3f2   :  { %v1198_v4 = vpop.f32.mrf.mxu1 }
 0x3f3   :  { %1204 = vst [vmem:[#allocation10 + $0x10] sm:$0xff] %v1197_v41  ;;  %v1199_v42 = vadd.f32 %v1198_v4, %v1013_v11 }
 0x3f5   :  { %1205 = vst [vmem:[#allocation10 + $0x18] sm:$0xff] %v1199_v42 }
 0x3f6   :  { %1468 = shalt.err (!%p1465_p5)
}
 0x3f7   :  { %1217 = dma.vmem_to_hbm [thread:$0]  %s1212_s11, 512, %s2015_s7, [#allocation6], %s1488_s2, %s1488_s2, %s1489_s16  }
 0x3f8   :  { %1481 = dma.done.wait [#allocation6], 512  }
 0x3f9   :  { %1482 = vsyncadd [#allocation6], 4294966784 }
 0x3fa   :  { %1221 = vsyncpa [#allocation5], 1 }
 0x3fb   :  { %1222 = vsyncpa [#allocation8], 1 }
 0x3fc   :  { %1223 = vsyncpa [#allocation6], 1 }

</bundles_post_ra>
